<compile_context>
chip_gen: v6e
topology: v6e:2x2x1
jax: 0.10.0
libtpu: 0.0.40
codegen_flags: <defaults>
</compile_context>

<pallas_src>
import jax
import jax.numpy as jnp
from jax.experimental import pallas as pl
from jax.experimental.pallas import tpu as pltpu

IN_FEATURES = 28 * 28     # 784
HIDDEN = 256
OUT_FEATURES = 10
N_PAD = 128               # lane-dense padded logits width


def _round_up(n: int, m: int) -> int:
    return ((n + m - 1) // m) * m


def net256_kernel(x_ref, w1_ref, b1_ref, w2_ref, b2_ref, out_ref):
    # x_ref: (TILE_B, 784) f32.  Cast to bf16 in-kernel so the f32->bf16
    # conversion is fused into the (pipelined, mem-bound) kernel instead of
    # costing an extra HBM pass in the wrapper.
    x = x_ref[...].astype(jnp.bfloat16)
    # fc1 + ReLU: bf16 MXU inputs, f32 accumulation; bias/ReLU math stays f32
    # (v5e has no bf16 VPU).
    h = jnp.dot(x, w1_ref[...], preferred_element_type=jnp.float32) + b1_ref[...]
    h = jnp.maximum(h, 0.0)
    # fc2 (no activation); output columns [10:128] are zero padding.
    y = jnp.dot(h.astype(jnp.bfloat16), w2_ref[...],
                preferred_element_type=jnp.float32) + b2_ref[...]
    out_ref[...] = y.astype(out_ref.dtype)


def prepare_params(params):
    """One-time parameter conversion (call once, NOT per forward): cast weights
    to bf16 and pad fc2's output dim to a lane-dense 128 columns."""
    (w1, b1), (w2, b2) = params["fc1"], params["fc2"]
    w1_p = w1.astype(jnp.bfloat16)                                  # (784, 256)
    b1_p = b1.reshape(1, HIDDEN).astype(jnp.float32)                # (1, 256)
    w2_p = jnp.pad(w2, ((0, 0), (0, N_PAD - OUT_FEATURES))).astype(jnp.bfloat16)
    b2_p = jnp.pad(b2.reshape(1, OUT_FEATURES),
                   ((0, 0), (0, N_PAD - OUT_FEATURES))).astype(jnp.float32)
    return (w1_p, b1_p, w2_p, b2_p)


def _choose_tile_b(batch: int) -> int:
    """Batch tile: multiples of 16 (bf16 packing tile); big tiles to amortize
    per-grid-step overhead, but keep >= 2 tiles for larger batches so v7x's
    second TensorCore gets work via the 'parallel' grid axis."""
    b16 = _round_up(batch, 16)
    if b16 <= 64:
        return b16                                   # tiny batch: single tile
    return min(1024, _round_up(pl.cdiv(b16, 2), 16))


def net256_forward(x_nchw, prepared):
    """x_nchw: (B, 1, 28, 28) float32. prepared: output of prepare_params()."""
    w1_p, b1_p, w2_p, b2_p = prepared
    B = x_nchw.shape[0]
    x_flat = x_nchw.reshape(B, -1).astype(jnp.float32)   # row-major == nn.Flatten

    TILE_B = _choose_tile_b(B)
    B_pad = _round_up(B, TILE_B)
    num_tiles = B_pad // TILE_B

    # Only batch padding; the 784 feature dim is left untouched (block last
    # dim == full array dim is legal), no wrapper-side cast.
    x_pad = x_flat if B_pad == B else jnp.pad(x_flat, ((0, B_pad - B), (0, 0)))

    out = pl.pallas_call(
        net256_kernel,
        out_shape=jax.ShapeDtypeStruct((B_pad, N_PAD), jnp.float32),
        grid=(num_tiles,),
        in_specs=[
            pl.BlockSpec((TILE_B, IN_FEATURES), lambda i: (i, 0)),  # x tile (pipelined)
            pl.BlockSpec((IN_FEATURES, HIDDEN), lambda i: (0, 0)),  # w1 (VMEM-resident)
            pl.BlockSpec((1, HIDDEN), lambda i: (0, 0)),            # b1
            pl.BlockSpec((HIDDEN, N_PAD), lambda i: (0, 0)),        # w2
            pl.BlockSpec((1, N_PAD), lambda i: (0, 0)),             # b2
        ],
        out_specs=pl.BlockSpec((TILE_B, N_PAD), lambda i: (i, 0)),
        compiler_params=pltpu.CompilerParams(
            dimension_semantics=("parallel",)),
    )(x_pad, w1_p, b1_p, w2_p, b2_p)

    return out[:B, :OUT_FEATURES]


def init_params(key):
    """Deterministic params. Weights (in, out); biases (1, out). Matches the
    PyTorch nn.Linear default init range (uniform +- 1/sqrt(fan_in))."""
    sizes = [(IN_FEATURES, HIDDEN), (HIDDEN, OUT_FEATURES)]
    names = ["fc1", "fc2"]
    params = {}
    for name, (fan_in, fan_out) in zip(names, sizes):
        key, kw, kb = jax.random.split(key, 3)
        bound = 1.0 / (fan_in ** 0.5)
        w = jax.random.uniform(kw, (fan_in, fan_out), jnp.float32, -bound, bound)
        b = jax.random.uniform(kb, (1, fan_out), jnp.float32, -bound, bound)
        params[name] = (w, b)
    return params


def reference_forward(x_nchw, params):
    """Plain-JAX f32 reference for sanity checking."""
    h = x_nchw.reshape(x_nchw.shape[0], -1)
    w1, b1 = params["fc1"]
    w2, b2 = params["fc2"]
    h = jnp.maximum(h @ w1 + b1, 0.0)
    return h @ w2 + b2


if __name__ == "__main__":
    key = jax.random.PRNGKey(0)
    key, kx = jax.random.split(key)
    batch = 8
    x = jax.random.normal(kx, (batch, 1, 28, 28), jnp.float32)

    params = init_params(key)
    prepared = prepare_params(params)   # one-time weight conversion

    out = net256_forward(x, prepared)
    out = jax.block_until_ready(out)

    ref = reference_forward(x, params)
    assert out.shape == (batch, OUT_FEATURES)
    # bf16 weights/activations in the matmuls -> loosened tolerance vs f32 ref.
    assert jnp.allclose(out, ref, atol=5e-2, rtol=5e-2), (
        f"max abs diff {jnp.max(jnp.abs(out - ref))}")

    print("KERNEL_OK")
</pallas_src>

<mosaic_0001>
module attributes {stable_mosaic.version = 11 : i64} {
  func.func @net256_kernel(%arg0: i32, %arg1: memref<16x784xf32, #tpu.memory_space<vmem>>, %arg2: memref<784x256xbf16, #tpu.memory_space<vmem>>, %arg3: memref<1x256xf32, #tpu.memory_space<vmem>>, %arg4: memref<256x128xbf16, #tpu.memory_space<vmem>>, %arg5: memref<1x128xf32, #tpu.memory_space<vmem>>, %arg6: memref<16x128xf32, #tpu.memory_space<vmem>>) attributes {dimension_semantics = [#tpu.dimension_semantics<parallel>], iteration_bounds = array<i64: 1>, scalar_prefetch = 0 : i64, scratch_operands = 0 : i64, tpu.core_type = #tpu.core_type<tc>, window_params = [{transform_indices = @transform_0, window_bounds = array<i64: 16, 784>}, {pipeline_mode = #tpu.pipeline_mode<synchronous>, transform_indices = @transform_1, window_bounds = array<i64: 784, 256>}, {pipeline_mode = #tpu.pipeline_mode<synchronous>, transform_indices = @transform_2, window_bounds = array<i64: 1, 256>}, {pipeline_mode = #tpu.pipeline_mode<synchronous>, transform_indices = @transform_3, window_bounds = array<i64: 256, 128>}, {pipeline_mode = #tpu.pipeline_mode<synchronous>, transform_indices = @transform_4, window_bounds = array<i64: 1, 128>}, {transform_indices = @transform_5, window_bounds = array<i64: 16, 128>}]} {
    %c0 = arith.constant 0 : index
    %c0_0 = arith.constant 0 : index
    %0 = vector.load %arg1[%c0, %c0_0] : memref<16x784xf32, #tpu.memory_space<vmem>>, vector<16x784xf32>
    %1 = arith.truncf %0 : vector<16x784xf32> to vector<16x784xbf16>
    %c0_1 = arith.constant 0 : index
    %c0_2 = arith.constant 0 : index
    %2 = vector.load %arg2[%c0_1, %c0_2] : memref<784x256xbf16, #tpu.memory_space<vmem>>, vector<784x256xbf16>
    %cst = arith.constant dense<0.000000e+00> : vector<16x256xf32>
    %3 = tpu.matmul %1, %2, %cst {dimension_numbers = #tpu.dot_dimension_numbers<[1], [0], [0], [1], [0, 0, 1, 1], [], []>} : vector<16x784xbf16>, vector<784x256xbf16>, vector<16x256xf32> -> vector<16x256xf32>
    %c0_3 = arith.constant 0 : index
    %c0_4 = arith.constant 0 : index
    %4 = vector.load %arg3[%c0_3, %c0_4] : memref<1x256xf32, #tpu.memory_space<vmem>>, vector<1x256xf32>
    %5 = vector.broadcast %4 : vector<1x256xf32> to vector<16x256xf32>
    %6 = arith.addf %3, %5 : vector<16x256xf32>
    %cst_5 = arith.constant 0.000000e+00 : f32
    %7 = vector.broadcast %cst_5 : f32 to vector<16x256xf32>
    %8 = arith.maximumf %6, %7 : vector<16x256xf32>
    %9 = arith.truncf %8 : vector<16x256xf32> to vector<16x256xbf16>
    %c0_6 = arith.constant 0 : index
    %c0_7 = arith.constant 0 : index
    %10 = vector.load %arg4[%c0_6, %c0_7] : memref<256x128xbf16, #tpu.memory_space<vmem>>, vector<256x128xbf16>
    %cst_8 = arith.constant dense<0.000000e+00> : vector<16x128xf32>
    %11 = tpu.matmul %9, %10, %cst_8 {dimension_numbers = #tpu.dot_dimension_numbers<[1], [0], [0], [1], [0, 0, 1, 1], [], []>} : vector<16x256xbf16>, vector<256x128xbf16>, vector<16x128xf32> -> vector<16x128xf32>
    %c0_9 = arith.constant 0 : index
    %c0_10 = arith.constant 0 : index
    %12 = vector.load %arg5[%c0_9, %c0_10] : memref<1x128xf32, #tpu.memory_space<vmem>>, vector<1x128xf32>
    %13 = vector.broadcast %12 : vector<1x128xf32> to vector<16x128xf32>
    %14 = arith.addf %11, %13 : vector<16x128xf32>
    %c0_11 = arith.constant 0 : index
    %c0_12 = arith.constant 0 : index
    %15 = vector.load %arg6[%c0_11, %c0_12] : memref<16x128xf32, #tpu.memory_space<vmem>>, vector<16x128xf32>
    tpu.vector_store %arg6[%c0_11, %c0_12], %14 {strides = array<i32>} : memref<16x128xf32, #tpu.memory_space<vmem>>, vector<16x128xf32>,
    return
  }
  func.func @transform_0(%arg0: i32) -> (i32, i32) {
    %c0_i32 = arith.constant 0 : i32
    %c0_i32_0 = arith.constant 0 : i32
    return %arg0, %c0_i32 : i32, i32
  }
  func.func @transform_1(%arg0: i32) -> (i32, i32) {
    %c0_i32 = arith.constant 0 : i32
    %c0_i32_0 = arith.constant 0 : i32
    %c0_i32_1 = arith.constant 0 : i32
    return %c0_i32, %c0_i32_0 : i32, i32
  }
  func.func @transform_2(%arg0: i32) -> (i32, i32) {
    %c0_i32 = arith.constant 0 : i32
    %c0_i32_0 = arith.constant 0 : i32
    %c0_i32_1 = arith.constant 0 : i32
    return %c0_i32, %c0_i32_0 : i32, i32
  }
  func.func @transform_3(%arg0: i32) -> (i32, i32) {
    %c0_i32 = arith.constant 0 : i32
    %c0_i32_0 = arith.constant 0 : i32
    %c0_i32_1 = arith.constant 0 : i32
    return %c0_i32, %c0_i32_0 : i32, i32
  }
  func.func @transform_4(%arg0: i32) -> (i32, i32) {
    %c0_i32 = arith.constant 0 : i32
    %c0_i32_0 = arith.constant 0 : i32
    %c0_i32_1 = arith.constant 0 : i32
    return %c0_i32, %c0_i32_0 : i32, i32
  }
  func.func @transform_5(%arg0: i32) -> (i32, i32) {
    %c0_i32 = arith.constant 0 : i32
    %c0_i32_0 = arith.constant 0 : i32
    return %arg0, %c0_i32 : i32, i32
  }
}

</mosaic_0001>

<bundles_post_ra>
// kernel: tpu_custom_call.1
= control target key start
LH: loop header
LB: loop body
LE: loop exit
PB: predicated region body
PF: predicated region fallthrough
CT: control target
= control target key end

     0   :  { %10 = vsyncpa [#allocation3], 0  ;;  %s1525_s0 = inlined_call_operand.hbm [shape: f32[16,784], index: 0, kind: input, shape index: {}]   ;;  %s1526_s1 = inlined_call_operand.hbm [shape: bf16[784,256], index: 1, kind: input, shape index: {}]   ;;  %s1527_s2 = inlined_call_operand.vmem [shape: f32[1,256], index: 2, kind: input, shape index: {}]   ;;  %s1528_s3 = inlined_call_operand.hbm [shape: bf16[256,128], index: 3, kind: input, shape index: {}]   ;;  %s1529_s4 = inlined_call_operand.vmem [shape: f32[1,128], index: 4, kind: input, shape index: {}]   ;;  %s1530_s5 = inlined_call_operand.hbm [shape: f32[16,128], index: 5, kind: output, shape index: {}]  }
   0x1   :  { %11 = vsyncpa [#allocation6], 0 }
   0x2   :  { %12 = vsyncpa [#allocation4], 0  ;;  %s1460_s18 = smov [#allocation5]  }
   0x3   :  { %s30_s19 = sshll.u32 %s1460_s18, 4  ;;  %s31_s19 = int_to_ptr.vmem [resolvable:$true] %s30_s19 }
   0x4   :  { %s1382_s20 = scalar_lea.vmem %s31_s19, 12544  ;;  %p1387_p1 = scmp.lt.s32.totalorder %s31_s19, %s31_s19 }
   0x5   :  { %p1383_p0 = scmp.ne.s32.totalorder %s31_s19, %s1382_s20  ;;  %p1388_p2 = scmp.lt.s32.totalorder %s1382_s20, %s1382_s20 }
   0x7   :  { %p1389_p3 = por %p1388_p2, %p1387_p1 }
   0x9   :  { %p1390_p4 = pnand %p1389_p3, %p1383_p0 }
   0xb   :  { %1393 = shalt.err (!%p1390_p4)
}
   0xc   :  { %s1461_s21 = smov 128   ;;  %s1462_s22 = smov 8  }
   0xd   :  { %36 = dma.hbm_to_vmem [thread:$0]  %s1526_s1, 12544, %s31_s19, [#allocation6], %s1461_s21, %s1461_s21, %s1462_s22  }
   0xe   :  { %s1463_s25 = smov [#allocation2]  }
   0xf   :  { %s18_s26 = sshll.u32 %s1463_s25, 4  ;;  %s19_s26 = int_to_ptr.vmem [resolvable:$true] %s18_s26 }
  0x10   :  { %s1402_s27 = scalar_lea.vmem %s19_s26, 1792  ;;  %p1407_p6 = scmp.lt.s32.totalorder %s19_s26, %s19_s26 }
  0x11   :  { %p1403_p5 = scmp.ne.s32.totalorder %s19_s26, %s1402_s27  ;;  %p1408_p7 = scmp.lt.s32.totalorder %s1402_s27, %s1402_s27 }
  0x13   :  { %p1409_p8 = por %p1408_p7, %p1407_p6 }
  0x15   :  { %p1410_p9 = pnand %p1409_p8, %p1403_p5 }
  0x17   :  { %1413 = shalt.err (!%p1410_p9)
}
  0x18   :  { %s1464_s28 = smov 896   ;;  %s1465_s29 = smov 56  }
  0x19   :  { %24 = dma.hbm_to_vmem [thread:$0]  %s1525_s0, 1792, %s19_s26, [#allocation3], %s1464_s28, %s1464_s28, %s1465_s29  }
  0x1a   :  { %s1466_s7 = smov [#allocation7]  }
  0x1b   :  { %s44_s8 = sshll.u32 %s1466_s7, 4  ;;  %s45_s8 = int_to_ptr.vmem [resolvable:$true] %s44_s8 }
  0x1c   :  { %s1422_s1 = scalar_lea.vmem %s45_s8, 2048  ;;  %p1427_p11 = scmp.lt.s32.totalorder %s45_s8, %s45_s8 }
  0x1d   :  { %p1423_p10 = scmp.ne.s32.totalorder %s45_s8, %s1422_s1  ;;  %p1428_p12 = scmp.lt.s32.totalorder %s1422_s1, %s1422_s1 }
  0x1f   :  { %p1429_p13 = por %p1428_p12, %p1427_p11 }
  0x21   :  { %p1430_p0 = pnand %p1429_p13, %p1423_p10 }
  0x23   :  { %1433 = shalt.err (!%p1430_p0)
}
  0x24   :  { %s1467_s9 = smov 64   ;;  %s1468_s10 = smov 4  }
  0x25   :  { %50 = dma.hbm_to_vmem [thread:$0]  %s1528_s3, 2048, %s45_s8, [#allocation6], %s1467_s9, %s1467_s9, %s1468_s10  }
  0x26   :  { %1454 = dma.done.wait [#allocation3], 1792  }
  0x27   :  { %1455 = vsyncadd [#allocation3], 4294965504 }
  0x28   :  { %1456 = dma.done.wait [#allocation6], 14592  }
  0x29   :  { %1457 = vsyncadd [#allocation6], 4294952704  ;;  %v1211_v0 = vld [vmem:[#allocation5 + $0x74] ss:$8 sps:$4 sm:$0xff]   ;;  %v1213_v1 = vld [vmem:[#allocation5 + $0x70] ss:$8 sps:$4 sm:$0xff]  }
  0x2a   :  { %688 = vmatprep.subr.bf16.mxu0 %v1211_v0  ;;  %v1214_v2 = vld [vmem:[#allocation5 + $0x174] ss:$8 sps:$4 sm:$0xff]   ;;  %v1216_v3 = vld [vmem:[#allocation5 + $0x170] ss:$8 sps:$4 sm:$0xff]   ;;  %v1217_v4 = vld [vmem:[#allocation5 + $0x64] ss:$8 sps:$4 sm:$0xff]  }
  0x2b   :  { %689 = vmatpush1.bf16.msra.mxu0 %v1213_v1  ;;  %v1219_v5 = vld [vmem:[#allocation5 + $0x60] ss:$8 sps:$4 sm:$0xff]   ;;  %731 = vmatprep.subr.bf16.mxu1 %v1214_v2  ;;  %v1220_v6 = vld [vmem:[#allocation5 + $0x164] ss:$8 sps:$4 sm:$0xff]   ;;  %v1223_v8 = vld [vmem:[#allocation5 + $0x54] ss:$8 sps:$4 sm:$0xff]  }
  0x2c   :  { %732 = vmatpush1.bf16.msra.mxu1 %v1216_v3  ;;  %690 = vmatprep.subr.bf16.mxu0 %v1217_v4  ;;  %v1222_v7 = vld [vmem:[#allocation5 + $0x160] ss:$8 sps:$4 sm:$0xff]   ;;  %v1225_v9 = vld [vmem:[#allocation5 + $0x50] ss:$8 sps:$4 sm:$0xff]   ;;  %v1226_v10 = vld [vmem:[#allocation5 + $0x154] ss:$8 sps:$4 sm:$0xff]  }
  0x2d   :  { %733 = vmatprep.subr.bf16.mxu1 %v1220_v6  ;;  %v1229_v11 = vld [vmem:[#allocation5 + $0x44] ss:$8 sps:$4 sm:$0xff]   ;;  %v1228_v12 = vld [vmem:[#allocation5 + $0x150] ss:$8 sps:$4 sm:$0xff]   ;;  %v1231_v14 = vld [vmem:[#allocation5 + $0x40] ss:$8 sps:$4 sm:$0xff]  }
  0x2e   :  { %v1232_v13 = vld [vmem:[#allocation5 + $0x144] ss:$8 sps:$4 sm:$0xff]   ;;  %v1235_v15 = vld [vmem:[#allocation5 + $0x34] ss:$8 sps:$4 sm:$0xff]   ;;  %v1234_v16 = vld [vmem:[#allocation5 + $0x140] ss:$8 sps:$4 sm:$0xff]  }
  0x2f   :  { %691 = vmatpush1.bf16.msra.mxu0 %v1219_v5  ;;  %v1238_v17 = vld [vmem:[#allocation5 + $0x134] ss:$8 sps:$4 sm:$0xff]   ;;  %v1237_v18 = vld [vmem:[#allocation5 + $0x30] ss:$8 sps:$4 sm:$0xff]   ;;  %v1241_v19 = vld [vmem:[#allocation5 + $0x24] ss:$8 sps:$4 sm:$0xff]  }
  0x30   :  { %692 = vmatprep.subr.bf16.mxu0 %v1223_v8  ;;  %734 = vmatpush1.bf16.msra.mxu1 %v1222_v7  ;;  %v1240_v20 = vld [vmem:[#allocation5 + $0x130] ss:$8 sps:$4 sm:$0xff]   ;;  %v1244_v21 = vld [vmem:[#allocation5 + $0x124] ss:$8 sps:$4 sm:$0xff]   ;;  %v1243_v22 = vld [vmem:[#allocation5 + $0x20] ss:$8 sps:$4 sm:$0xff]  }
  0x31   :  { %735 = vmatprep.subr.bf16.mxu1 %v1226_v10  ;;  %v1247_v23 = vld [vmem:[#allocation5 + $0x14] ss:$8 sps:$4 sm:$0xff]   ;;  %v1246_v24 = vld [vmem:[#allocation5 + $0x120] ss:$8 sps:$4 sm:$0xff]   ;;  %v1249_v26 = vld [vmem:[#allocation5 + $0x10] ss:$8 sps:$4 sm:$0xff]  }
  0x32   :  { %v1250_v25 = vld [vmem:[#allocation5 + $0x114] ss:$8 sps:$4 sm:$0xff]   ;;  %v1253_v27 = vld [vmem:[#allocation5 + $0x4] ss:$8 sps:$4 sm:$0xff]   ;;  %v1252_v28 = vld [vmem:[#allocation5 + $0x110] ss:$8 sps:$4 sm:$0xff]  }
  0x33   :  { %693 = vmatpush1.bf16.msra.mxu0 %v1225_v9  ;;  %v1256_v29 = vld [vmem:[#allocation5 + $0x104] ss:$8 sps:$4 sm:$0xff]   ;;  %v1255_v30 = vld [vmem:[#allocation5] ss:$8 sps:$4 sm:$0xff]   ;;  %v1259_v31 = vld [vmem:[#allocation5 + $0xf4] ss:$8 sps:$4 sm:$0xff]  }
  0x34   :  { %694 = vmatprep.subr.bf16.mxu0 %v1229_v11  ;;  %736 = vmatpush1.bf16.msra.mxu1 %v1228_v12  ;;  %v1258_v32 = vld [vmem:[#allocation5 + $0x100] ss:$8 sps:$4 sm:$0xff]   ;;  %v1262_v33 = vld [vmem:[#allocation5 + $0x1f4] ss:$8 sps:$4 sm:$0xff]   ;;  %v1261_v34 = vld [vmem:[#allocation5 + $0xf0] ss:$8 sps:$4 sm:$0xff]  }
  0x35   :  { %737 = vmatprep.subr.bf16.mxu1 %v1232_v13  ;;  %v1265_v35 = vld [vmem:[#allocation5 + $0xe4] ss:$8 sps:$4 sm:$0xff]   ;;  %v1264_v36 = vld [vmem:[#allocation5 + $0x1f0] ss:$8 sps:$4 sm:$0xff]   ;;  %v1267_v38 = vld [vmem:[#allocation5 + $0xe0] ss:$8 sps:$4 sm:$0xff]  }
  0x36   :  { %v1268_v37 = vld [vmem:[#allocation5 + $0x1e4] ss:$8 sps:$4 sm:$0xff]   ;;  %v1271_v39 = vld [vmem:[#allocation5 + $0xd4] ss:$8 sps:$4 sm:$0xff]   ;;  %v1270_v40 = vld [vmem:[#allocation5 + $0x1e0] ss:$8 sps:$4 sm:$0xff]  }
  0x37   :  { %695 = vmatpush1.bf16.msra.mxu0 %v1231_v14  ;;  %v1274_v41 = vld [vmem:[#allocation5 + $0x1d4] ss:$8 sps:$4 sm:$0xff]   ;;  %v1273_v42 = vld [vmem:[#allocation5 + $0xd0] ss:$8 sps:$4 sm:$0xff]   ;;  %v1277_v43 = vld [vmem:[#allocation5 + $0xc4] ss:$8 sps:$4 sm:$0xff]  }
  0x38   :  { %696 = vmatprep.subr.bf16.mxu0 %v1235_v15  ;;  %738 = vmatpush1.bf16.msra.mxu1 %v1234_v16  ;;  %v1276_v44 = vld [vmem:[#allocation5 + $0x1d0] ss:$8 sps:$4 sm:$0xff]   ;;  %v1280_v45 = vld [vmem:[#allocation5 + $0x1c4] ss:$8 sps:$4 sm:$0xff]   ;;  %v1279_v48 = vld [vmem:[#allocation5 + $0xc0] ss:$8 sps:$4 sm:$0xff]  }
  0x39   :  { %739 = vmatprep.subr.bf16.mxu1 %v1238_v17  ;;  %v64_v46 = vld [vmem:[#allocation2 + $0x8] sm:$0xff]  ;;  %v71_v47 = vld [vmem:[#allocation2 + $0x40] sm:$0xff]  ;;  %v1282_v51 = vld [vmem:[#allocation5 + $0x1c0] ss:$8 sps:$4 sm:$0xff]   ;;  %vm684_vm0 = vcmask 130048   ;;  %s1470_s14 = smov [#allocation8]  }
  0x3a   :  { %v78_v49 = vpack.c.bf16 %v71_v47, %v64_v46  ;;  %v1283_v50 = vld [vmem:[#allocation5 + $0xb4] ss:$8 sps:$4 sm:$0xff]   ;;  %v66_v52 = vld [vmem:[#allocation2 + $0x18] sm:$0xff]  ;;  %v73_v53 = vld [vmem:[#allocation2 + $0x50] sm:$0xff]  ;;  %s1049_s15 = sshll.u32 %s1470_s14, 4  ;;  %s1050_s15 = int_to_ptr.vmem [resolvable:$true] %s1049_s15 }
  0x3b   :  { %697 = vmatpush1.bf16.msra.mxu0 %v1237_v18  ;;  %v1286_v54 = vld [vmem:[#allocation5 + $0x1b4] ss:$8 sps:$4 sm:$0xff]   ;;  %v80_v55 = vpack.c.bf16 %v73_v53, %v66_v52  ;;  %v1285_v56 = vld [vmem:[#allocation5 + $0xb0] ss:$8 sps:$4 sm:$0xff]   ;;  %v1289_v57 = vld [vmem:[#allocation5 + $0xa4] ss:$8 sps:$4 sm:$0xff]   ;;  %p1439_p2 = scmp.lt.s32.totalorder %s1050_s15, %s1050_s15 }
  0x3c   :  { %698 = vmatprep.subr.bf16.mxu0 %v1241_v19  ;;  %740 = vmatpush1.bf16.msra.mxu1 %v1240_v20  ;;  %v1288_v58 = vld [vmem:[#allocation5 + $0x1b0] ss:$8 sps:$4 sm:$0xff]   ;;  %v1292_v59 = vld [vmem:[#allocation5 + $0x1a4] ss:$8 sps:$4 sm:$0xff]   ;;  %v1291_v60 = vld [vmem:[#allocation5 + $0xa0] ss:$8 sps:$4 sm:$0xff]  }
  0x3d   :  { %741 = vmatprep.subr.bf16.mxu1 %v1244_v21  ;;  %720 = vmatprep.mubr.bf16.mxu0 %v78_v49  ;;  %v1295_v61 = vld [vmem:[#allocation5 + $0x94] ss:$8 sps:$4 sm:$0xff]   ;;  %v1294_v62 = vld [vmem:[#allocation5 + $0x1a0] ss:$8 sps:$4 sm:$0xff]   ;;  %v1297_v0 = vld [vmem:[#allocation5 + $0x90] ss:$8 sps:$4 sm:$0xff]  }
  0x3e   :  { %763 = vmatprep.mubr.bf16.mxu1 %v80_v55  ;;  %v1298_v63 = vld [vmem:[#allocation5 + $0x194] ss:$8 sps:$4 sm:$0xff]   ;;  %v1300_v1 = vld [vmem:[#allocation5 + $0x190] ss:$8 sps:$4 sm:$0xff]   ;;  %v1301_v2 = vld [vmem:[#allocation5 + $0x84] ss:$8 sps:$4 sm:$0xff]  }
  0x3f   :  { %699 = vmatpush1.bf16.msra.mxu0 %v1243_v22  ;;  %v1303_v3 = vld [vmem:[#allocation5 + $0x80] ss:$8 sps:$4 sm:$0xff]   ;;  %v1304_v4 = vld [vmem:[#allocation5 + $0x184] ss:$8 sps:$4 sm:$0xff]   ;;  %v63_v5 = vld [vmem:[#allocation2] sm:$0xff]  ;;  %v1469_v21 = vmov 0  }
  0x40   :  { %700 = vmatprep.subr.bf16.mxu0 %v1247_v23  ;;  %742 = vmatpush1.bf16.msra.mxu1 %v1246_v24  ;;  %v1306_v6 = vld [vmem:[#allocation5 + $0x180] ss:$8 sps:$4 sm:$0xff]   ;;  %v1309_v8 = vld [vmem:[#allocation5 + $0x274] ss:$8 sps:$4 sm:$0xff]   ;;  %v1307_v12 = vld [vmem:[#allocation5 + $0x270] ss:$8 sps:$4 sm:$0xff]  }
  0x41   :  { %743 = vmatprep.subr.bf16.mxu1 %v1250_v25  ;;  %v70_v7 = vld [vmem:[#allocation2 + $0x38] sm:$0xff]  ;;  %v65_v9 = vld [vmem:[#allocation2 + $0x10] sm:$0xff]  ;;  %v72_v10 = vld [vmem:[#allocation2 + $0x48] sm:$0xff]  ;;  %s1434_s16 = scalar_lea.vmem %s1050_s15, 256 }
  0x42   :  { %v77_v11 = vpack.c.bf16 %v70_v7, %v63_v5  ;;  %v79_v13 = vpack.c.bf16 %v72_v10, %v65_v9  ;;  %v1312_v14 = vld [vmem:[#allocation5 + $0x264] ss:$8 sps:$4 sm:$0xff]   ;;  %v1352_v15 = vld [vmem:[#allocation5 + $0x300] ss:$8 sps:$4 sm:$0xff]   ;;  %v1315_v18 = vld [vmem:[#allocation5 + $0x254] ss:$8 sps:$4 sm:$0xff]   ;;  %p1435_p1 = scmp.ne.s32.totalorder %s1050_s15, %s1434_s16  ;;  %p1440_p3 = scmp.lt.s32.totalorder %s1434_s16, %s1434_s16 }
  0x43   :  { %701 = vmatpush1.bf16.msra.mxu0 %v1249_v26  ;;  %v1354_v16 = vld [vmem:[#allocation5 + $0x304] ss:$8 sps:$4 sm:$0xff]   ;;  %v1310_v17 = vld [vmem:[#allocation5 + $0x260] ss:$8 sps:$4 sm:$0xff]   ;;  %v68_v19 = vld [vmem:[#allocation2 + $0x28] sm:$0xff] }
  0x44   :  { %702 = vmatprep.subr.bf16.mxu0 %v1253_v27  ;;  %744 = vmatpush1.bf16.msra.mxu1 %v1252_v28  ;;  %v1313_v20 = vld [vmem:[#allocation5 + $0x250] ss:$8 sps:$4 sm:$0xff]   ;;  %v69_v22 = vld [vmem:[#allocation2 + $0x30] sm:$0xff]  ;;  %v1351_v49 = vld [vmem:[#allocation5 + $0x294] ss:$8 sps:$4 sm:$0xff]   ;;  %p1441_p4 = por %p1440_p3, %p1439_p2 }
  0x45   :  { %745 = vmatprep.subr.bf16.mxu1 %v1256_v29  ;;  %v76_v23 = vld [vmem:[#allocation2 + $0x68] sm:$0xff]  ;;  %v75_v24 = vld [vmem:[#allocation2 + $0x60] sm:$0xff]  ;;  %v1318_v25 = vld [vmem:[#allocation5 + $0x244] ss:$8 sps:$4 sm:$0xff]  }
  0x46   :  { %v82_v26 = vpack.c.bf16 %v75_v24, %v68_v19  ;;  %v83_v27 = vpack.c.bf16 %v76_v23, %v69_v22  ;;  %v1316_v28 = vld [vmem:[#allocation5 + $0x240] ss:$8 sps:$4 sm:$0xff]   ;;  %v1321_v29 = vld [vmem:[#allocation5 + $0x234] ss:$8 sps:$4 sm:$0xff]   ;;  %v1343_v46 = vld [vmem:[#allocation5 + $0x2b0] ss:$8 sps:$4 sm:$0xff]   ;;  %p1442_p5 = pnand %p1441_p4, %p1435_p1 }
  0x47   :  { %703 = vmatpush1.bf16.msra.mxu0 %v1255_v30  ;;  %v1319_v30 = vld [vmem:[#allocation5 + $0x230] ss:$8 sps:$4 sm:$0xff]   ;;  %v1348_v47 = vld [vmem:[#allocation5 + $0x2a4] ss:$8 sps:$4 sm:$0xff]   ;;  %v1355_v52 = vld [vmem:[#allocation5 + $0x280] ss:$8 sps:$4 sm:$0xff]  }
  0x48   :  { %704 = vmatprep.subr.bf16.mxu0 %v1259_v31  ;;  %746 = vmatpush1.bf16.msra.mxu1 %v1258_v32  ;;  %v1324_v31 = vld [vmem:[#allocation5 + $0x224] ss:$8 sps:$4 sm:$0xff]   ;;  %v1322_v32 = vld [vmem:[#allocation5 + $0x220] ss:$8 sps:$4 sm:$0xff]   ;;  %v67_v53 = vld [vmem:[#allocation2 + $0x20] sm:$0xff] }
  0x49   :  { %747 = vmatprep.subr.bf16.mxu1 %v1262_v33  ;;  %v1327_v33 = vld [vmem:[#allocation5 + $0x214] ss:$8 sps:$4 sm:$0xff]  }
  0x4a   :  { %v1371_v5 = vld [vmem:[#allocation7 + $0x8] sm:$0xff]   ;;  %v1373_v7 = vld [vmem:[#allocation7] sm:$0xff]  }
  0x4b   :  { %705 = vmatpush2.bf16.msra.mxu0 %v1261_v34  ;;  %v1325_v34 = vld [vmem:[#allocation5 + $0x210] ss:$8 sps:$4 sm:$0xff]  }
  0x4c   :  { %706 = vmatprep.subr.bf16.mxu0 %v1265_v35  ;;  %748 = vmatpush2.bf16.msra.mxu1 %v1264_v36  ;;  %v1330_v35 = vld [vmem:[#allocation5 + $0x204] ss:$8 sps:$4 sm:$0xff]   ;;  %v1328_v36 = vld [vmem:[#allocation5 + $0x200] ss:$8 sps:$4 sm:$0xff]  }
  0x4d   :  { %749 = vmatprep.subr.bf16.mxu1 %v1268_v37  ;;  %v1333_v37 = vld [vmem:[#allocation5 + $0x2f4] ss:$8 sps:$4 sm:$0xff]  }
  0x4f   :  { %707 = vmatpush2.bf16.msra.mxu0 %v1267_v38  ;;  %v1331_v38 = vld [vmem:[#allocation5 + $0x2f0] ss:$8 sps:$4 sm:$0xff]  }
  0x50   :  { %708 = vmatprep.subr.bf16.mxu0 %v1271_v39  ;;  %750 = vmatpush2.bf16.msra.mxu1 %v1270_v40  ;;  %v1336_v39 = vld [vmem:[#allocation5 + $0x2e4] ss:$8 sps:$4 sm:$0xff]   ;;  %v1334_v40 = vld [vmem:[#allocation5 + $0x2e0] ss:$8 sps:$4 sm:$0xff]  }
  0x51   :  { %751 = vmatprep.subr.bf16.mxu1 %v1274_v41  ;;  %v1339_v41 = vld [vmem:[#allocation5 + $0x2d4] ss:$8 sps:$4 sm:$0xff]  }
  0x53   :  { %709 = vmatpush2.bf16.msra.mxu0 %v1273_v42  ;;  %v1337_v42 = vld [vmem:[#allocation5 + $0x2d0] ss:$8 sps:$4 sm:$0xff]  }
  0x54   :  { %710 = vmatprep.subr.bf16.mxu0 %v1277_v43  ;;  %752 = vmatpush2.bf16.msra.mxu1 %v1276_v44  ;;  %v1342_v43 = vld [vmem:[#allocation5 + $0x2c4] ss:$8 sps:$4 sm:$0xff]   ;;  %v1340_v44 = vld [vmem:[#allocation5 + $0x2c0] ss:$8 sps:$4 sm:$0xff]  }
  0x55   :  { %753 = vmatprep.subr.bf16.mxu1 %v1280_v45  ;;  %v1345_v45 = vld [vmem:[#allocation5 + $0x2b4] ss:$8 sps:$4 sm:$0xff]  }
  0x57   :  { %711 = vmatpush2.bf16.msra.mxu0 %v1279_v48  ;;  %v1346_v48 = vld [vmem:[#allocation5 + $0x2a0] ss:$8 sps:$4 sm:$0xff]  }
  0x58   :  { %712 = vmatprep.subr.bf16.mxu0 %v1283_v50  ;;  %754 = vmatpush2.bf16.msra.mxu1 %v1282_v51  ;;  %v1349_v50 = vld [vmem:[#allocation5 + $0x290] ss:$8 sps:$4 sm:$0xff]   ;;  %v1357_v51 = vld [vmem:[#allocation5 + $0x284] ss:$8 sps:$4 sm:$0xff]  }
  0x59   :  { %755 = vmatprep.subr.bf16.mxu1 %v1286_v54  ;;  %v74_v54 = vld [vmem:[#allocation2 + $0x58] sm:$0xff] }
  0x5a   :  { %v81_v55 = vpack.c.bf16 %v74_v54, %v67_v53  ;;  %v1161_v54 = vld [vmem:[%s1529_s4] ss:$0 sm:$0xff] }
  0x5b   :  { %713 = vmatpush2.bf16.msra.mxu0 %v1285_v56  ;;  %v1358_v56 = vld [vmem:[#allocation7 + $0x78] sm:$0xff]  }
  0x5c   :  { %714 = vmatprep.subr.bf16.mxu0 %v1289_v57  ;;  %756 = vmatpush2.bf16.msra.mxu1 %v1288_v58  ;;  %v1359_v57 = vld [vmem:[#allocation7 + $0x38] sm:$0xff]   ;;  %v1360_v58 = vld [vmem:[#allocation7 + $0x70] sm:$0xff]  }
  0x5d   :  { %757 = vmatprep.subr.bf16.mxu1 %v1292_v59  ;;  %v1361_v59 = vld [vmem:[#allocation7 + $0x30] sm:$0xff]  }
  0x5f   :  { %715 = vmatpush2.bf16.msra.mxu0 %v1291_v60  ;;  %v1362_v60 = vld [vmem:[#allocation7 + $0x68] sm:$0xff]  }
  0x60   :  { %716 = vmatprep.subr.bf16.mxu0 %v1295_v61  ;;  %758 = vmatpush2.bf16.msra.mxu1 %v1294_v62  ;;  %v1363_v61 = vld [vmem:[#allocation7 + $0x28] sm:$0xff]   ;;  %v1364_v62 = vld [vmem:[#allocation7 + $0x60] sm:$0xff]  }
  0x61   :  { %759 = vmatprep.subr.bf16.mxu1 %v1298_v63  ;;  %v1365_v63 = vld [vmem:[#allocation7 + $0x20] sm:$0xff]  }
  0x63   :  { %717 = vmatpush2.bf16.msra.mxu0 %v1297_v0  ;;  %v1366_v0 = vld [vmem:[#allocation7 + $0x58] sm:$0xff]  }
  0x64   :  { %718 = vmatprep.subr.bf16.mxu0 %v1301_v2  ;;  %760 = vmatpush2.bf16.msra.mxu1 %v1300_v1  ;;  %v1367_v1 = vld [vmem:[#allocation7 + $0x18] sm:$0xff]   ;;  %v1368_v2 = vld [vmem:[#allocation7 + $0x50] sm:$0xff]  }
  0x65   :  { %761 = vmatprep.subr.bf16.mxu1 %v1304_v4  ;;  %v1370_v4 = vld [vmem:[#allocation7 + $0x48] sm:$0xff]  }
  0x67   :  { %719 = vmatpush2.bf16.msra.mxu0 %v1303_v3  ;;  %v1369_v3 = vld [vmem:[#allocation7 + $0x10] sm:$0xff]  }
  0x68   :  { %774 = vmatprep.subr.bf16.mxu0 %v1309_v8  ;;  %762 = vmatpush2.bf16.msra.mxu1 %v1306_v6  ;;  %v1372_v6 = vld [vmem:[#allocation7 + $0x40] sm:$0xff]   ;;  %v184_v8 = vlaneseq }
  0x69   :  { %831 = vmatprep.subr.bf16.mxu1 %v1354_v16 }
  0x6a   :  { %721 = vmatmul.mubr.bf16.vlgmr.msra.gmra.mxu0 %v77_v11  ;;  %v185_v10 = vshrl.u32 %v184_v8, 7 }
  0x6b   :  { %775 = vmatpush1.bf16.msra.mxu0 %v1307_v12  ;;  %764 = vmatmul.mubr.bf16.vlgmr.msra.gmra.mxu1 %v79_v13 }
  0x6c   :  { %776 = vmatprep.subr.bf16.mxu0 %v1312_v14  ;;  %849 = vmatprep.mubr.bf16.mxu1 %v1469_v21  ;;  %v190_v13 = vsub.s32 1, %v185_v10  ;;  %v182_v14 = vld [vmem:[%s1527_s2] sm:$0x3] }
  0x6d   :  { %832 = vmatpush1.bf16.msra.mxu1 %v1352_v15  ;;  %806 = vmatprep.mubr.bf16.mxu0 %v82_v26  ;;  %v186_v15 = vsub.s32 0, %v185_v10 }
  0x6e   :  { %1178 = vmatprep.subr.bf16.mxu1 %v1358_v56 }
  0x6f   :  { %777 = vmatpush1.bf16.msra.mxu0 %v1310_v17  ;;  %v187_v19 = vrot.slane %v182_v14, %v186_v15 }
  0x70   :  { %778 = vmatprep.subr.bf16.mxu0 %v1315_v18  ;;  %v191_v18 = vrot.slane %v182_v14, %v190_v13 }
  0x73   :  { %779 = vmatpush1.bf16.msra.mxu0 %v1313_v20  ;;  %1160 = vmatmul.mubr.msk.bf16.vlgmr.msra.gmra.mxu1 %vm684_vm0, %v83_v27 }
  0x74   :  { %780 = vmatprep.subr.bf16.mxu0 %v1318_v25  ;;  %1179 = vmatpush3.bf16.msra.mxu1 %v1359_v57 }
  0x75   :  { %1180 = vmatprep.subr.bf16.mxu1 %v1360_v58 }
  0x77   :  { %781 = vmatpush1.bf16.msra.mxu0 %v1316_v28 }
  0x78   :  { %782 = vmatprep.subr.bf16.mxu0 %v1321_v29  ;;  %1181 = vmatpush3.bf16.msra.mxu1 %v1361_v59 }
  0x79   :  { %1182 = vmatprep.subr.bf16.mxu1 %v1362_v60 }
  0x7b   :  { %783 = vmatpush1.bf16.msra.mxu0 %v1319_v30 }
  0x7c   :  { %784 = vmatprep.subr.bf16.mxu0 %v1324_v31  ;;  %1183 = vmatpush3.bf16.msra.mxu1 %v1363_v61 }
  0x7d   :  { %1184 = vmatprep.subr.bf16.mxu1 %v1364_v62 }
  0x7f   :  { %785 = vmatpush1.bf16.msra.mxu0 %v1322_v32 }
  0x80   :  { %786 = vmatprep.subr.bf16.mxu0 %v1327_v33  ;;  %1185 = vmatpush3.bf16.msra.mxu1 %v1365_v63 }
  0x81   :  { %1186 = vmatprep.subr.bf16.mxu1 %v1366_v0 }
  0x83   :  { %787 = vmatpush1.bf16.msra.mxu0 %v1325_v34 }
  0x84   :  { %788 = vmatprep.subr.bf16.mxu0 %v1330_v35  ;;  %1187 = vmatpush3.bf16.msra.mxu1 %v1367_v1 }
  0x85   :  { %1188 = vmatprep.subr.bf16.mxu1 %v1368_v2 }
  0x87   :  { %789 = vmatpush1.bf16.msra.mxu0 %v1328_v36 }
  0x88   :  { %790 = vmatprep.subr.bf16.mxu0 %v1333_v37  ;;  %1189 = vmatpush3.bf16.msra.mxu1 %v1369_v3 }
  0x89   :  { %1190 = vmatprep.subr.bf16.mxu1 %v1370_v4 }
  0x8b   :  { %791 = vmatpush2.bf16.msra.mxu0 %v1331_v38 }
  0x8c   :  { %792 = vmatprep.subr.bf16.mxu0 %v1336_v39  ;;  %1191 = vmatpush3.bf16.msra.mxu1 %v1371_v5 }
  0x8d   :  { %1192 = vmatprep.subr.bf16.mxu1 %v1372_v6 }
  0x8f   :  { %793 = vmatpush2.bf16.msra.mxu0 %v1334_v40 }
  0x90   :  { %794 = vmatprep.subr.bf16.mxu0 %v1339_v41  ;;  %1193 = vmatpush3.bf16.msra.mxu1 %v1373_v7 }
  0x93   :  { %795 = vmatpush2.bf16.msra.mxu0 %v1337_v42 }
  0x94   :  { %796 = vmatprep.subr.bf16.mxu0 %v1342_v43 }
  0x97   :  { %797 = vmatpush2.bf16.msra.mxu0 %v1340_v44 }
  0x98   :  { %798 = vmatprep.subr.bf16.mxu0 %v1345_v45 }
  0x9b   :  { %799 = vmatpush2.bf16.msra.mxu0 %v1343_v46 }
  0x9c   :  { %800 = vmatprep.subr.bf16.mxu0 %v1348_v47 }
  0x9f   :  { %801 = vmatpush2.bf16.msra.mxu0 %v1346_v48 }
  0xa0   :  { %802 = vmatprep.subr.bf16.mxu0 %v1351_v49 }
  0xa3   :  { %803 = vmatpush2.bf16.msra.mxu0 %v1349_v50 }
  0xa4   :  { %804 = vmatprep.subr.bf16.mxu0 %v1357_v51 }
  0xa7   :  { %805 = vmatpush2.bf16.msra.mxu0 %v1355_v52 }
  0xaa   :  { %807 = vmatmul.mubr.bf16.vlgmr.msra.gmra.mxu0 %v81_v55 }
 0x12a   :  { %v722_v11 = vpop.f32.mrf.mxu0 }
 0x12b   :  { %v765_v9 = vpop.f32.mrf.mxu1  ;;  %v723_v24 = vadd.f32 %v722_v11, %v187_v19 }
 0x12c   :  { %v724_v16 = vpop.f32.mrf.mxu0 }
 0x12d   :  { %v767_v12 = vpop.f32.mrf.mxu1  ;;  %v725_v23 = vadd.f32 %v724_v16, %v191_v18  ;;  %v766_v31 = vadd.f32 %v765_v9, %v723_v24 }
 0x12e   :  { %v726_v20 = vpop.f32.mrf.mxu0 }
 0x12f   :  { %v769_v17 = vpop.f32.mrf.mxu1  ;;  %v727_v26 = vadd.f32 %v726_v20, %v187_v19  ;;  %v768_v29 = vadd.f32 %v767_v12, %v725_v23 }
 0x130   :  { %v728_v25 = vpop.f32.mrf.mxu0 }
 0x131   :  { %v771_v21 = vpop.f32.mrf.mxu1  ;;  %v729_v30 = vadd.f32 %v728_v25, %v191_v18  ;;  %v770_v33 = vadd.f32 %v769_v17, %v727_v26 }
 0x133   :  { %v851_v22 = vpop.f32.mrf.mxu1  ;;  %v772_v38 = vadd.f32 %v771_v21, %v729_v30 }
 0x135   :  { %v853_v27 = vpop.f32.mrf.mxu1 }
 0x137   :  { %v855_v36 = vpop.f32.mrf.mxu1 }
 0x139   :  { %v857_v45 = vpop.f32.mrf.mxu1 }
 0x16a   :  { %v808_v28 = vpop.f32.mrf.mxu0 }
 0x16b   :  { %v809_v35 = vadd.f32 %v808_v28, %v766_v31 }
 0x16c   :  { %v810_v32 = vpop.f32.mrf.mxu0 }
 0x16d   :  { %v811_v34 = vadd.f32 %v810_v32, %v768_v29  ;;  %v852_v44 = vadd.f32 %v851_v22, %v809_v35 }
 0x16e   :  { %v812_v37 = vpop.f32.mrf.mxu0 }
 0x16f   :  { %v813_v39 = vadd.f32 %v812_v37, %v770_v33  ;;  %v854_v41 = vadd.f32 %v853_v27, %v811_v34  ;;  %v860_v50 = vmax.f32 %v852_v44, 0.0 }
 0x170   :  { %v814_v40 = vpop.f32.mrf.mxu0 }
 0x171   :  { %v856_v42 = vadd.f32 %v855_v36, %v813_v39  ;;  %v815_v43 = vadd.f32 %v814_v40, %v772_v38  ;;  %v861_v48 = vmax.f32 %v854_v41, 0.0 }
 0x173   :  { %v858_v46 = vadd.f32 %v857_v45, %v815_v43  ;;  %v862_v47 = vmax.f32 %v856_v42, 0.0 }
 0x175   :  { %v863_v49 = vmax.f32 %v858_v46, 0.0  ;;  %v864_v52 = vpack.c.bf16 %v862_v47, %v860_v50 }
 0x177   :  { %v865_v51 = vpack.c.bf16 %v863_v49, %v861_v48 }
 0x179   :  { %1033 = vmatprep.mubr.bf16.mxu1 %v865_v51 }
 0x17a   :  { %1034 = vmatmul.mubr.bf16.vlgmr.msra.gmra.mxu1 %v864_v52 }
 0x23a   :  { %v1194_v53 = vpop.f32.mrf.mxu1 }
 0x23c   :  { %v1195_v55 = vpop.f32.mrf.mxu1 }
 0x23d   :  { %v1196_v56 = vadd.f32 %v1195_v55, %v1194_v53 }
 0x23e   :  { %v1197_v57 = vpop.f32.mrf.mxu1 }
 0x23f   :  { %v1036_v58 = vadd.f32 %v1196_v56, %v1161_v54 }
 0x240   :  { %v1198_v59 = vpop.f32.mrf.mxu1 }
 0x241   :  { %1042 = vst [vmem:[#allocation8] sm:$0xff] %v1036_v58  ;;  %v1199_v60 = vadd.f32 %v1198_v59, %v1197_v57 }
 0x243   :  { %v1039_v61 = vadd.f32 %v1199_v60, %v1161_v54 }
 0x245   :  { %1043 = vst [vmem:[#allocation8 + $0x8] sm:$0xff] %v1039_v61 }
 0x246   :  { %1445 = shalt.err (!%p1442_p5)
}
 0x247   :  { %1055 = dma.vmem_to_hbm [thread:$0]  %s1050_s15, 256, %s1530_s5, [#allocation4], %s1461_s21, %s1461_s21, %s1462_s22  }
 0x248   :  { %1458 = dma.done.wait [#allocation4], 256  }
 0x249   :  { %1459 = vsyncadd [#allocation4], 4294967040 }
 0x24a   :  { %1059 = vsyncpa [#allocation3], 1 }
 0x24b   :  { %1060 = vsyncpa [#allocation6], 1 }
 0x24c   :  { %1061 = vsyncpa [#allocation4], 1 }

</bundles_post_ra>
